<compile_context>
chip_gen: v7x
topology: tpu7x:2x2x1
jax: 0.10.0
libtpu: 0.0.40
codegen_flags: <defaults>
</compile_context>

<pallas_src>
import numpy as np
import jax
import jax.numpy as jnp
from jax.experimental import pallas as pl
from jax.experimental.pallas import tpu as pltpu


# ----------------------------- Pallas kernel -------------------------------

def _residual_kernel(x_ref, wx_ref, wy_ref, h_ref, o_ref):
    """One row tile (R = batches_per_tile * L rows, channels-last).

    x_ref : (R, Cin)        bf16 activations
    wx_ref: (Cin, 3*Cout)   bf16 [w1*s1 | wr_tap0*sr | wr_tap1*sr]
    wy_ref: (Cout, 2*Cout)  bf16 [w2_tap0*s2 | w2_tap1*s2]
    h_ref : (3, Cout)       f32  [h1; h2; hr] (BN shift, conv bias folded in)
    o_ref : (R, Cout)       bf16 lane-dense output rows
    """
    x = x_ref[...]
    R = x.shape[0]
    C = h_ref.shape[1]

    h1 = h_ref[0:1, :]
    h2 = h_ref[1:2, :]
    hr = h_ref[2:3, :]

    # One wide MXU matmul (N = 3*Cout) covers conv1 + both conv4res taps.
    z = jnp.dot(x, wx_ref[...], preferred_element_type=jnp.float32)   # (R,3C)

    # main path: conv1 (k=1) -> bn1 (scale folded into wx) -> relu -> bf16
    y = jnp.maximum(z[:, :C] + h1, 0.0).astype(jnp.bfloat16)

    # shortcut path: conv4res (k=2, stride=1) -> bn4res
    # out[t] = tap0[t] + tap1[t+1]; roll(-1) puts row t+1 at row t.  The wrap
    # at the last row of each batch is trimmed by the caller (tiles always
    # land on batch boundaries).
    y1 = z[:, C:2 * C] + pltpu.roll(z[:, 2 * C:3 * C], shift=R - 1, axis=0) + hr

    # main path: conv2 (k=2, stride=1) -> bn2 -> relu, one N=2*Cout matmul
    zy = jnp.dot(y, wy_ref[...], preferred_element_type=jnp.float32)  # (R,2C)
    y2 = jnp.maximum(
        zy[:, :C] + pltpu.roll(zy[:, C:2 * C], shift=R - 1, axis=0) + h2, 0.0)

    o_ref[...] = (y1 + y2).astype(o_ref.dtype)            # bf16 lane-dense store


# ----------------------------- tiling helpers --------------------------------

def _vmem_limit_bytes():
    """Generation-aware VMEM ceiling with headroom (v7x only has 64 MiB)."""
    try:
        cap = int(pltpu.get_tpu_info().vmem_capacity_bytes)
    except Exception:
        cap = 64 * 1024 * 1024          # conservative: v7x per-TC capacity
    return max(32 * 1024 * 1024, (cap * 3) // 4)


def _pick_batches_per_tile(B, L, Cin, Cout, vmem_budget_bytes):
    """Largest whole-batch row tile that fits the VMEM budget.

    Invariant: a tile is always a whole number of batches (multiple of L
    rows) so the roll-based k=2 shift-add never mixes data across tiles.
    Target 512-2048 rows per tile for DMA/compute overlap.
    """
    # Rough per-row VMEM: double-buffered bf16 in/out + f32/bf16 temporaries.
    bytes_per_row = (2 * (2 * Cin) + 2 * (2 * Cout)            # pipelined in/out
                     + 4 * (3 * Cout + 2 * Cout + 3 * Cout)    # z, zy, y1/y2/sum
                     + 2 * Cout)                               # bf16 y
    target_rows = min(2048, max(L, vmem_budget_bytes // bytes_per_row))

    bt = 1
    for d in range(1, B + 1):
        if B % d == 0 and d * L <= target_rows:
            bt = d
    # Prefer >= 4 grid steps (>= 2 per TensorCore on v7x) when the tile stays
    # reasonably large; on v5e/v6e (1 TC) extra steps just deepen the pipeline.
    while (bt % 2 == 0) and (B // bt < 4) and ((bt // 2) * L >= 256):
        bt //= 2
    return bt


# ----------------------------- wrappers --------------------------------------

def residual_forward_rows(x_rows, params, B, L):
    """Channels-last core: x_rows (B*L, Cin) bf16 -> (B*L, Cout) bf16.

    Row t = L-1 of every batch is a wrapped k=2 position and must be dropped
    by the consumer (the conv k=2 output length is L-1).  A channels-last
    (NWC) model should call this directly and skip all layout glue.
    """
    Cin = x_rows.shape[1]
    Cout = params["h"].shape[1]

    vmem_limit = _vmem_limit_bytes()
    bt = _pick_batches_per_tile(B, L, Cin, Cout, vmem_limit // 2)
    R = bt * L                       # rows per tile (batch-aligned)
    G = B // bt                      # row tiles

    return pl.pallas_call(
        _residual_kernel,
        grid=(G,),
        in_specs=[
            pl.BlockSpec((R, Cin), lambda g: (g, 0)),          # activations
            pl.BlockSpec((Cin, 3 * Cout), lambda g: (0, 0)),   # conv1 + conv4res
            pl.BlockSpec((Cout, 2 * Cout), lambda g: (0, 0)),  # conv2 (both taps)
            pl.BlockSpec((3, Cout), lambda g: (0, 0)),         # BN shifts
        ],
        out_specs=pl.BlockSpec((R, Cout), lambda g: (g, 0)),
        out_shape=jax.ShapeDtypeStruct((B * L, Cout), jnp.bfloat16),
        compiler_params=pltpu.CompilerParams(
            dimension_semantics=("parallel",),
            vmem_limit_bytes=vmem_limit),
    )(x_rows, params["wx"], params["wy"], params["h"])


def residual_forward(x_ncw, params):
    """PyTorch semantics adapter: x (B, Cin, L) f32 -> (B, Cout, L-1) f32.

    NOTE: the NCW<->NWC transposes here are extra HBM passes outside the
    fused kernel; channels-last callers should use residual_forward_rows.
    """
    B, Cin, L = x_ncw.shape
    Cout = params["h"].shape[1]

    x_rows = (jnp.transpose(x_ncw, (0, 2, 1))
              .reshape(B * L, Cin)
              .astype(jnp.bfloat16))

    out = residual_forward_rows(x_rows, params, B, L)

    # conv k=2 output length is L-1: drop the wrapped last position per batch.
    out = out.reshape(B, L, Cout)[:, :L - 1, :].astype(jnp.float32)
    return jnp.transpose(out, (0, 2, 1))                      # (B, Cout, L-1)


# ----------------------------- parameters -----------------------------------

def init_params(key, in_channels, out_channels):
    eps = 1e-5
    keys = iter(jax.random.split(key, 6))

    def conv_w(cout, cin, k):   # PyTorch Conv1d default init bounds
        bound = 1.0 / np.sqrt(cin * k)
        return jax.random.uniform(next(keys), (cout, cin, k), jnp.float32,
                                  -bound, bound)

    def conv_b(cout, cin, k):
        bound = 1.0 / np.sqrt(cin * k)
        return jax.random.uniform(next(keys), (cout,), jnp.float32,
                                  -bound, bound)

    def bn_fold(conv_bias):
        # eval-mode BN with default running stats, folded with the conv bias
        gamma = jnp.ones((out_channels,), jnp.float32)
        beta = jnp.zeros((out_channels,), jnp.float32)
        mean = jnp.zeros((out_channels,), jnp.float32)
        var = jnp.ones((out_channels,), jnp.float32)
        scale = gamma / jnp.sqrt(var + eps)
        shift = (conv_bias - mean) * scale + beta
        return scale, shift

    w1 = conv_w(out_channels, in_channels, 1)    # conv1
    b1 = conv_b(out_channels, in_channels, 1)
    w2 = conv_w(out_channels, out_channels, 2)   # conv2
    b2 = conv_b(out_channels, out_channels, 2)
    wr = conv_w(out_channels, in_channels, 2)    # conv4res
    br = conv_b(out_channels, in_channels, 2)

    s1, h1 = bn_fold(b1)
    s2, h2 = bn_fold(b2)
    sr, hr = bn_fold(br)

    # Channels-last weights with BN scale folded in (f32), taps concatenated
    # along the output (N) axis, then cast to bf16 for the MXU.
    w1_cl = jnp.transpose(w1[:, :, 0], (1, 0)) * s1            # (Cin, Cout)
    wr0 = jnp.transpose(wr[:, :, 0], (1, 0)) * sr              # (Cin, Cout)
    wr1 = jnp.transpose(wr[:, :, 1], (1, 0)) * sr
    w20 = jnp.transpose(w2[:, :, 0], (1, 0)) * s2              # (Cout, Cout)
    w21 = jnp.transpose(w2[:, :, 1], (1, 0)) * s2

    return {
        "wx": jnp.concatenate([w1_cl, wr0, wr1], axis=1).astype(jnp.bfloat16),  # (Cin, 3*Cout)
        "wy": jnp.concatenate([w20, w21], axis=1).astype(jnp.bfloat16),         # (Cout, 2*Cout)
        "h": jnp.stack([h1, h2, hr], axis=0),                                   # (3, Cout) f32
    }


# ----------------------------- reference (plain JAX) ------------------------

def residual_ref(x_ncw, params):
    B, Cin, L = x_ncw.shape
    Cout = params["h"].shape[1]
    f32 = lambda t: t.astype(jnp.float32)

    x = f32(jnp.transpose(x_ncw, (0, 2, 1)).astype(jnp.bfloat16))  # (B, L, Cin)
    wx, wy, h = f32(params["wx"]), f32(params["wy"]), params["h"]
    w1, wr0, wr1 = wx[:, :Cout], wx[:, Cout:2 * Cout], wx[:, 2 * Cout:]
    w20, w21 = wy[:, :Cout], wy[:, Cout:]
    h1, h2, hr = h[0], h[1], h[2]

    y = jnp.maximum(jnp.einsum("blc,cd->bld", x, w1) + h1, 0.0)
    y = f32(y.astype(jnp.bfloat16))
    y2 = (jnp.einsum("blc,cd->bld", y[:, :-1], w20)
          + jnp.einsum("blc,cd->bld", y[:, 1:], w21) + h2)
    y2 = jnp.maximum(y2, 0.0)

    y1 = (jnp.einsum("blc,cd->bld", x[:, :-1], wr0)
          + jnp.einsum("blc,cd->bld", x[:, 1:], wr1) + hr)
    return jnp.transpose(y1 + y2, (0, 2, 1))                       # (B, Cout, L-1)


# ----------------------------- main ------------------------------------------

if __name__ == "__main__":
    key = jax.random.PRNGKey(0)
    k_x, k_p = jax.random.split(key)

    B, Cin, Cout, L = 4, 64, 128, 32
    x = jax.random.normal(k_x, (B, Cin, L), jnp.float32)
    params = init_params(k_p, Cin, Cout)

    fwd = jax.jit(lambda inp: residual_forward(inp, params))
    out = jax.block_until_ready(fwd(x))
    assert out.shape == (B, Cout, L - 1)

    ref = residual_ref(x, params)
    np.testing.assert_allclose(np.asarray(out), np.asarray(ref),
                               rtol=2e-2, atol=2e-2)
    print("KERNEL_OK")
</pallas_src>

<mosaic_0001>
module attributes {stable_mosaic.version = 11 : i64} {
  func.func @_residual_kernel(%arg0: i32, %arg1: memref<128x64xbf16, #tpu.memory_space<vmem>>, %arg2: memref<64x384xbf16, #tpu.memory_space<vmem>>, %arg3: memref<128x256xbf16, #tpu.memory_space<vmem>>, %arg4: memref<3x128xf32, #tpu.memory_space<vmem>>, %arg5: memref<128x128xbf16, #tpu.memory_space<vmem>>) attributes {dimension_semantics = [#tpu.dimension_semantics<parallel>], iteration_bounds = array<i64: 1>, scalar_prefetch = 0 : i64, scratch_operands = 0 : i64, tpu.core_type = #tpu.core_type<tc>, window_params = [{transform_indices = @transform_0, window_bounds = array<i64: 128, 64>}, {pipeline_mode = #tpu.pipeline_mode<synchronous>, transform_indices = @transform_1, window_bounds = array<i64: 64, 384>}, {pipeline_mode = #tpu.pipeline_mode<synchronous>, transform_indices = @transform_2, window_bounds = array<i64: 128, 256>}, {pipeline_mode = #tpu.pipeline_mode<synchronous>, transform_indices = @transform_3, window_bounds = array<i64: 3, 128>}, {transform_indices = @transform_4, window_bounds = array<i64: 128, 128>}]} {
    %c0 = arith.constant 0 : index
    %c0_0 = arith.constant 0 : index
    %0 = vector.load %arg1[%c0, %c0_0] : memref<128x64xbf16, #tpu.memory_space<vmem>>, vector<128x64xbf16>
    %c0_1 = arith.constant 0 : index
    %c0_2 = arith.constant 0 : index
    %1 = vector.load %arg4[%c0_1, %c0_2] : memref<3x128xf32, #tpu.memory_space<vmem>>, vector<1x128xf32>
    %c1 = arith.constant 1 : index
    %c0_3 = arith.constant 0 : index
    %2 = vector.load %arg4[%c1, %c0_3] : memref<3x128xf32, #tpu.memory_space<vmem>>, vector<1x128xf32>
    %c2 = arith.constant 2 : index
    %c0_4 = arith.constant 0 : index
    %3 = vector.load %arg4[%c2, %c0_4] : memref<3x128xf32, #tpu.memory_space<vmem>>, vector<1x128xf32>
    %c0_5 = arith.constant 0 : index
    %c0_6 = arith.constant 0 : index
    %4 = vector.load %arg2[%c0_5, %c0_6] : memref<64x384xbf16, #tpu.memory_space<vmem>>, vector<64x384xbf16>
    %cst = arith.constant dense<0.000000e+00> : vector<128x384xf32>
    %5 = tpu.matmul %0, %4, %cst {dimension_numbers = #tpu.dot_dimension_numbers<[1], [0], [0], [1], [0, 0, 1, 1], [], []>} : vector<128x64xbf16>, vector<64x384xbf16>, vector<128x384xf32> -> vector<128x384xf32>
    %6 = vector.extract_strided_slice %5 {offsets = [0, 0], sizes = [128, 128], strides = [1, 1]} : vector<128x384xf32> to vector<128x128xf32>
    %7 = vector.broadcast %1 : vector<1x128xf32> to vector<128x128xf32>
    %8 = arith.addf %6, %7 : vector<128x128xf32>
    %cst_7 = arith.constant 0.000000e+00 : f32
    %9 = vector.broadcast %cst_7 : f32 to vector<128x128xf32>
    %10 = arith.maximumf %8, %9 : vector<128x128xf32>
    %11 = arith.truncf %10 : vector<128x128xf32> to vector<128x128xbf16>
    %12 = vector.extract_strided_slice %5 {offsets = [0, 128], sizes = [128, 128], strides = [1, 1]} : vector<128x384xf32> to vector<128x128xf32>
    %13 = vector.extract_strided_slice %5 {offsets = [0, 256], sizes = [128, 128], strides = [1, 1]} : vector<128x384xf32> to vector<128x128xf32>
    %c127_i32 = arith.constant 127 : i32
    %14 = tpu.dynamic_rotate %13 by %c127_i32 dim 0 : vector<128x128xf32>, i32 -> vector<128x128xf32>
    %15 = arith.addf %12, %14 : vector<128x128xf32>
    %16 = vector.broadcast %3 : vector<1x128xf32> to vector<128x128xf32>
    %17 = arith.addf %15, %16 : vector<128x128xf32>
    %c0_8 = arith.constant 0 : index
    %c0_9 = arith.constant 0 : index
    %18 = vector.load %arg3[%c0_8, %c0_9] : memref<128x256xbf16, #tpu.memory_space<vmem>>, vector<128x256xbf16>
    %cst_10 = arith.constant dense<0.000000e+00> : vector<128x256xf32>
    %19 = tpu.matmul %11, %18, %cst_10 {dimension_numbers = #tpu.dot_dimension_numbers<[1], [0], [0], [1], [0, 0, 1, 1], [], []>} : vector<128x128xbf16>, vector<128x256xbf16>, vector<128x256xf32> -> vector<128x256xf32>
    %20 = vector.extract_strided_slice %19 {offsets = [0, 0], sizes = [128, 128], strides = [1, 1]} : vector<128x256xf32> to vector<128x128xf32>
    %21 = vector.extract_strided_slice %19 {offsets = [0, 128], sizes = [128, 128], strides = [1, 1]} : vector<128x256xf32> to vector<128x128xf32>
    %c127_i32_11 = arith.constant 127 : i32
    %22 = tpu.dynamic_rotate %21 by %c127_i32_11 dim 0 : vector<128x128xf32>, i32 -> vector<128x128xf32>
    %23 = arith.addf %20, %22 : vector<128x128xf32>
    %24 = vector.broadcast %2 : vector<1x128xf32> to vector<128x128xf32>
    %25 = arith.addf %23, %24 : vector<128x128xf32>
    %cst_12 = arith.constant 0.000000e+00 : f32
    %26 = vector.broadcast %cst_12 : f32 to vector<128x128xf32>
    %27 = arith.maximumf %25, %26 : vector<128x128xf32>
    %28 = arith.addf %17, %27 : vector<128x128xf32>
    %29 = arith.truncf %28 : vector<128x128xf32> to vector<128x128xbf16>
    %c0_13 = arith.constant 0 : index
    %c0_14 = arith.constant 0 : index
    %30 = vector.load %arg5[%c0_13, %c0_14] : memref<128x128xbf16, #tpu.memory_space<vmem>>, vector<128x128xbf16>
    tpu.vector_store %arg5[%c0_13, %c0_14], %29 {strides = array<i32>} : memref<128x128xbf16, #tpu.memory_space<vmem>>, vector<128x128xbf16>,
    return
  }
  func.func @transform_0(%arg0: i32) -> (i32, i32) {
    %c0_i32 = arith.constant 0 : i32
    %c0_i32_0 = arith.constant 0 : i32
    return %arg0, %c0_i32 : i32, i32
  }
  func.func @transform_1(%arg0: i32) -> (i32, i32) {
    %c0_i32 = arith.constant 0 : i32
    %c0_i32_0 = arith.constant 0 : i32
    %c0_i32_1 = arith.constant 0 : i32
    return %c0_i32, %c0_i32_0 : i32, i32
  }
  func.func @transform_2(%arg0: i32) -> (i32, i32) {
    %c0_i32 = arith.constant 0 : i32
    %c0_i32_0 = arith.constant 0 : i32
    %c0_i32_1 = arith.constant 0 : i32
    return %c0_i32, %c0_i32_0 : i32, i32
  }
  func.func @transform_3(%arg0: i32) -> (i32, i32) {
    %c0_i32 = arith.constant 0 : i32
    %c0_i32_0 = arith.constant 0 : i32
    %c0_i32_1 = arith.constant 0 : i32
    return %c0_i32, %c0_i32_0 : i32, i32
  }
  func.func @transform_4(%arg0: i32) -> (i32, i32) {
    %c0_i32 = arith.constant 0 : i32
    %c0_i32_0 = arith.constant 0 : i32
    return %arg0, %c0_i32 : i32, i32
  }
}

</mosaic_0001>

<bundles_post_ra>
// kernel: _lambda_.1
= control target key start
LH: loop header
LB: loop body
LE: loop exit
PB: predicated region body
PF: predicated region fallthrough
CT: control target
= control target key end

     0   :  { %v1135_v1 = vmov 0   ;;  %vm157_vm0 = vcmask 523264   ;;  %v452_v37 = vlaneseq  ;;  %s1517_s1 = inlined_call_operand.vmem [shape: bf16[64,384], index: 1, kind: input, shape index: {}]   ;;  %s1518_s0 = inlined_call_operand.vmem [shape: bf16[128,64], index: 0, kind: input, shape index: {}]   ;;  %s1519_s2 = inlined_call_operand.vmem [shape: bf16[128,256], index: 2, kind: input, shape index: {}]   ;;  %s1520_s3 = inlined_call_operand.vmem [shape: f32[3,128], index: 3, kind: input, shape index: {}]   ;;  %s1521_s4 = inlined_call_operand.vmem [shape: bf16[128,128], index: 4, kind: output, shape index: {}]  }
   0x1   :  { %v1087_v0 = vld [vmem:[%s1517_s1 + $0x4] ss:$12 sps:$4 sm:$0xff]   ;;  %214 = vmatprep.mubr.bf16.mxu0 %v1135_v1  ;;  %v1089_v2 = vld [vmem:[%s1517_s1 + $0x8] ss:$12 sps:$4 sm:$0xff]   ;;  %v1090_v3 = vld [vmem:[%s1517_s1] ss:$12 sps:$4 sm:$0xff]  }
   0x2   :  { %182 = vmatprep.subr.bf16.mxu0 %v1087_v0  ;;  %1046 = vmatprep.subr.bf16.mxu1 %v1089_v2  ;;  %v1091_v4 = vld [vmem:[%s1517_s1 + $0x1c] ss:$12 sps:$4 sm:$0xff]   ;;  %v1093_v5 = vld [vmem:[%s1517_s1 + $0x20] ss:$12 sps:$4 sm:$0xff]   ;;  %v1094_v6 = vld [vmem:[%s1517_s1 + $0x18] ss:$12 sps:$4 sm:$0xff]  }
   0x3   :  { %183 = vmatpush1.bf16.msra.mxu0 %v1090_v3  ;;  %1047 = vmatpush3.bf16.msra.mxu1 %v1089_v2  ;;  %v1095_v7 = vld [vmem:[%s1517_s1 + $0x34] ss:$12 sps:$4 sm:$0xff]   ;;  %v1097_v8 = vld [vmem:[%s1517_s1 + $0x38] ss:$12 sps:$4 sm:$0xff]   ;;  %v1098_v9 = vld [vmem:[%s1517_s1 + $0x30] ss:$12 sps:$4 sm:$0xff]  }
   0x4   :  { %184 = vmatprep.subr.bf16.mxu0 %v1091_v4  ;;  %1048 = vmatprep.subr.bf16.mxu1 %v1093_v5  ;;  %v1099_v10 = vld [vmem:[%s1517_s1 + $0x4c] ss:$12 sps:$4 sm:$0xff]   ;;  %v1101_v11 = vld [vmem:[%s1517_s1 + $0x50] ss:$12 sps:$4 sm:$0xff]   ;;  %v1103_v12 = vld [vmem:[%s1518_s0] sm:$0xff]   ;;  %v1300_v39 = vshrl.u32 %v452_v37, 7 }
   0x5   :  { %v1102_v13 = vld [vmem:[%s1517_s1 + $0x48] ss:$12 sps:$4 sm:$0xff]   ;;  %1054 = vmatprep.mubr.msk.bf16.mxu1 %vm157_vm0, %v1103_v12  ;;  %v1113_v17 = vld [vmem:[%s1519_s2 + $0x4] ss:$8 sps:$4 sm:$0xff]   ;;  %v1114_v19 = vld [vmem:[%s1519_s2 + $0x10] ss:$8 sps:$4 sm:$0xff]  }
   0x6   :  { %v1104_v14 = vld [vmem:[%s1518_s0 + $0x8] sm:$0xff]   ;;  %v1105_v15 = vld [vmem:[%s1518_s0 + $0x10] sm:$0xff]   ;;  %v1106_v20 = vld [vmem:[%s1518_s0 + $0x18] sm:$0xff]   ;;  %vm454_vm1 = vcmp.lt.s32.totalorder %v1300_v39, 7 }
   0x7   :  { %185 = vmatpush1.bf16.msra.mxu0 %v1094_v6  ;;  %1049 = vmatpush3.bf16.msra.mxu1 %v1093_v5  ;;  %v1111_v16 = vld [vmem:[%s1519_s2] ss:$8 sps:$4 sm:$0xff]   ;;  %v1116_v18 = vld [vmem:[%s1519_s2 + $0x14] ss:$8 sps:$4 sm:$0xff]   ;;  %v1119_v23 = vld [vmem:[%s1519_s2 + $0x24] ss:$8 sps:$4 sm:$0xff]  }
   0x8   :  { %186 = vmatprep.subr.bf16.mxu0 %v1095_v7  ;;  %1050 = vmatprep.subr.bf16.mxu1 %v1097_v8  ;;  %v1107_v21 = vld [vmem:[%s1518_s0 + $0x20] sm:$0xff]   ;;  %v1122_v24 = vld [vmem:[%s1519_s2 + $0x34] ss:$8 sps:$4 sm:$0xff]   ;;  %v1120_v25 = vld [vmem:[%s1519_s2 + $0x30] ss:$8 sps:$4 sm:$0xff]  }
   0x9   :  { %v1117_v22 = vld [vmem:[%s1519_s2 + $0x20] ss:$8 sps:$4 sm:$0xff]   ;;  %v1109_v27 = vld [vmem:[%s1518_s0 + $0x30] sm:$0xff]   ;;  %v1125_v28 = vld [vmem:[%s1519_s2 + $0x44] ss:$8 sps:$4 sm:$0xff]  }
   0xa   :  { %v1108_v26 = vld [vmem:[%s1518_s0 + $0x28] sm:$0xff]   ;;  %v1128_v30 = vld [vmem:[%s1519_s2 + $0x54] ss:$8 sps:$4 sm:$0xff]   ;;  %v1126_v31 = vld [vmem:[%s1519_s2 + $0x50] ss:$8 sps:$4 sm:$0xff]  }
   0xb   :  { %187 = vmatpush1.bf16.msra.mxu0 %v1098_v9  ;;  %1051 = vmatpush3.bf16.msra.mxu1 %v1097_v8  ;;  %v1123_v29 = vld [vmem:[%s1519_s2 + $0x40] ss:$8 sps:$4 sm:$0xff]   ;;  %v1110_v32 = vld [vmem:[%s1518_s0 + $0x38] sm:$0xff]   ;;  %v1131_v33 = vld [vmem:[%s1519_s2 + $0x64] ss:$8 sps:$4 sm:$0xff]  }
   0xc   :  { %188 = vmatprep.subr.bf16.mxu0 %v1099_v10  ;;  %1052 = vmatprep.subr.bf16.mxu1 %v1101_v11  ;;  %v1129_v34 = vld [vmem:[%s1519_s2 + $0x60] ss:$8 sps:$4 sm:$0xff]   ;;  %v1134_v35 = vld [vmem:[%s1519_s2 + $0x74] ss:$8 sps:$4 sm:$0xff]   ;;  %v1132_v36 = vld [vmem:[%s1519_s2 + $0x70] ss:$8 sps:$4 sm:$0xff]  }
   0xd   :  { %v1298_v38 = vld [vmem:[%s1520_s3] ss:$0 sm:$0xff] }
   0xf   :  { %189 = vmatpush1.bf16.msra.mxu0 %v1102_v13  ;;  %1053 = vmatpush3.bf16.msra.mxu1 %v1101_v11 }
  0x10   :  { %603 = vmatprep.subr.bf16.mxu0 %v1113_v17  ;;  %1070 = vmatprep.subr.bf16.mxu1 %v1113_v17 }
  0x12   :  { %920 = vmatmul.mubr.msk.bf16.vlgmr.msra.gmra.mrb[0].mxu0 %vm157_vm0, %v1103_v12  ;;  %1055 = vmatmul.mubr.msk.bf16.vlgmr.msra.gmra.mrb[0].mxu1 %vm157_vm0, %v1104_v14 }
  0x13   :  { %224 = vmatprep.mubr.bf16.mxu0 %v1135_v1  ;;  %1058 = vmatprep.mubr.msk.bf16.mxu1 %vm157_vm0, %v1105_v15 }
  0x14   :  { %604 = vmatpush1.bf16.msra.mxu0 %v1111_v16  ;;  %1078 = vmatpush1.bf16.msra.mxu1 %v1111_v16 }
  0x15   :  { %605 = vmatprep.subr.bf16.mxu0 %v1116_v18  ;;  %1071 = vmatprep.subr.bf16.mxu1 %v1116_v18 }
  0x18   :  { %606 = vmatpush1.bf16.msra.mxu0 %v1114_v19  ;;  %1079 = vmatpush1.bf16.msra.mxu1 %v1114_v19 }
  0x19   :  { %607 = vmatprep.subr.bf16.mxu0 %v1119_v23  ;;  %1072 = vmatprep.subr.bf16.mxu1 %v1119_v23 }
  0x1a   :  { %921 = vmatmul.mubr.msk.bf16.gmra.mrb[4].mxu0 %vm157_vm0, %v1104_v14  ;;  %1059 = vmatmul.mubr.msk.bf16.gmra.mrb[4].mxu1 %vm157_vm0, %v1106_v20 }
  0x1b   :  { %234 = vmatprep.mubr.bf16.mxu0 %v1135_v1  ;;  %1062 = vmatprep.mubr.msk.bf16.mxu1 %vm157_vm0, %v1107_v21 }
  0x1c   :  { %608 = vmatpush1.bf16.msra.mxu0 %v1117_v22  ;;  %1080 = vmatpush1.bf16.msra.mxu1 %v1117_v22 }
  0x1d   :  { %609 = vmatprep.subr.bf16.mxu0 %v1122_v24  ;;  %1073 = vmatprep.subr.bf16.mxu1 %v1122_v24 }
  0x20   :  { %610 = vmatpush1.bf16.msra.mxu0 %v1120_v25  ;;  %1081 = vmatpush1.bf16.msra.mxu1 %v1120_v25 }
  0x21   :  { %611 = vmatprep.subr.bf16.mxu0 %v1125_v28  ;;  %1074 = vmatprep.subr.bf16.mxu1 %v1125_v28 }
  0x22   :  { %922 = vmatmul.mubr.msk.bf16.gmra.mrb[8].mxu0 %vm157_vm0, %v1105_v15  ;;  %1063 = vmatmul.mubr.msk.bf16.gmra.mrb[8].mxu1 %vm157_vm0, %v1108_v26 }
  0x23   :  { %244 = vmatprep.mubr.bf16.mxu0 %v1135_v1  ;;  %1066 = vmatprep.mubr.msk.bf16.mxu1 %vm157_vm0, %v1109_v27 }
  0x24   :  { %612 = vmatpush1.bf16.msra.mxu0 %v1123_v29  ;;  %1082 = vmatpush1.bf16.msra.mxu1 %v1123_v29 }
  0x25   :  { %613 = vmatprep.subr.bf16.mxu0 %v1128_v30  ;;  %1075 = vmatprep.subr.bf16.mxu1 %v1128_v30 }
  0x28   :  { %614 = vmatpush1.bf16.msra.mxu0 %v1126_v31  ;;  %1083 = vmatpush1.bf16.msra.mxu1 %v1126_v31 }
  0x29   :  { %615 = vmatprep.subr.bf16.mxu0 %v1131_v33  ;;  %1076 = vmatprep.subr.bf16.mxu1 %v1131_v33 }
  0x2a   :  { %923 = vmatmul.mubr.msk.bf16.gmra.mrb[12].mxu0 %vm157_vm0, %v1106_v20  ;;  %1067 = vmatmul.mubr.msk.bf16.gmra.mrb[12].mxu1 %vm157_vm0, %v1110_v32 }
  0x2b   :  { %254 = vmatprep.mubr.bf16.mxu0 %v1135_v1  ;;  %655 = vmatprep.mubr.bf16.mxu1 %v1135_v1 }
  0x2c   :  { %616 = vmatpush1.bf16.msra.mxu0 %v1129_v34  ;;  %1084 = vmatpush1.bf16.msra.mxu1 %v1129_v34 }
  0x2d   :  { %617 = vmatprep.subr.bf16.mxu0 %v1134_v35  ;;  %1077 = vmatprep.subr.bf16.mxu1 %v1134_v35 }
  0x30   :  { %618 = vmatpush1.bf16.msra.mxu0 %v1132_v36  ;;  %1085 = vmatpush1.bf16.msra.mxu1 %v1132_v36 }
  0x32   :  { %924 = vmatmul.mubr.msk.bf16.gmra.mrb[16].mxu0 %vm157_vm0, %v1107_v21 }
  0x33   :  { %264 = vmatprep.mubr.bf16.mxu0 %v1135_v1 }
  0x3a   :  { %925 = vmatmul.mubr.msk.bf16.gmra.mrb[20].mxu0 %vm157_vm0, %v1108_v26 }
  0x3b   :  { %274 = vmatprep.mubr.bf16.mxu0 %v1135_v1 }
  0x42   :  { %926 = vmatmul.mubr.msk.bf16.gmra.mrb[24].mxu0 %vm157_vm0, %v1109_v27 }
  0x43   :  { %284 = vmatprep.mubr.bf16.mxu0 %v1135_v1 }
  0x4a   :  { %927 = vmatmul.mubr.msk.bf16.gmra.mrb[28].mxu0 %vm157_vm0, %v1110_v32 }
  0x4b   :  { %635 = vmatprep.mubr.bf16.mxu0 %v1135_v1 }
  0xe5   :  { %v216_v40 = vpop.f32.mrb[0].mxu0  ;;  %v1056_v41 = vpop.f32.mrb[0].mxu1 }
  0xe6   :  { %v396_v42 = vadd.f32 %v1298_v38, %v216_v40  ;;  %v218_v43 = vpop.f32.mrb[1].mxu0  ;;  %v1303_v44 = vpop.f32.mrb[1].mxu1  ;;  %v438_v45 = vrot.slane %v1056_v41, 1 }
  0xe7   :  { %v436_v46 = vrot.slane %v1303_v44, 1  ;;  %v220_v47 = vpop.f32.mrb[2].mxu0  ;;  %v1057_v48 = vpop.f32.mrb[2].mxu1 }
  0xe8   :  { %v397_v49 = vadd.f32 %v1298_v38, %v220_v47  ;;  %v439_v50 = vrot.slane %v1057_v48, 1  ;;  %v222_v51 = vpop.f32.mrb[3].mxu0  ;;  %v332_v52 = vpop.f32.mrb[3].mxu1  ;;  %v412_v54 = vmax.f32 %v396_v42, 0.0 }
  0xe9   :  { %v437_v53 = vrot.slane %v332_v52, 1 }
  0xea   :  { %v413_v55 = vmax.f32 %v397_v49, 0.0  ;;  %v467_v56 = vsel %vm454_vm1, %v438_v45, %v439_v50 }
  0xeb   :  { %v468_v57 = vsel %vm454_vm1, %v437_v53, %v438_v45  ;;  %v469_v58 = vsel %vm454_vm1, %v436_v46, %v437_v53 }
  0xec   :  { %v428_v59 = vpack.c.bf16 %v413_v55, %v412_v54  ;;  %v1316_v60 = vadd.f32 %v469_v58, %v218_v43  ;;  %v1318_v61 = vadd.f32 %v468_v57, %v222_v51 }
  0xed   :  { %v226_v62 = vpop.f32.mrb[4].mxu0  ;;  %v1060_v63 = vpop.f32.mrb[4].mxu1 }
  0xee   :  { %v398_v0 = vadd.f32 %v1298_v38, %v226_v62  ;;  %v228_v2 = vpop.f32.mrb[5].mxu0  ;;  %v345_v3 = vpop.f32.mrb[5].mxu1  ;;  %636 = vmatmul.mubr.bf16.vlgmr.msra.gmra.mrb[32].mxu0 %v428_v59  ;;  %v442_v4 = vrot.slane %v1060_v63, 1 }
  0xef   :  { %v1321_v5 = vadd.f32 %v467_v56, %v228_v2  ;;  %v440_v6 = vrot.slane %v345_v3, 1  ;;  %v230_v7 = vpop.f32.mrb[6].mxu0  ;;  %v1061_v8 = vpop.f32.mrb[6].mxu1  ;;  %645 = vmatprep.mubr.bf16.mxu0 %v1135_v1 }
  0xf0   :  { %v399_v9 = vadd.f32 %v1298_v38, %v230_v7  ;;  %v232_v10 = vpop.f32.mrb[7].mxu0  ;;  %v443_v11 = vrot.slane %v1061_v8, 1  ;;  %v348_v12 = vpop.f32.mrb[7].mxu1  ;;  %v414_v15 = vmax.f32 %v398_v0, 0.0 }
  0xf1   :  { %v466_v13 = vsel %vm454_vm1, %v439_v50, %v440_v6  ;;  %v441_v14 = vrot.slane %v348_v12, 1 }
  0xf2   :  { %v415_v16 = vmax.f32 %v399_v9, 0.0  ;;  %v1327_v17 = vadd.f32 %v466_v13, %v232_v10  ;;  %v463_v18 = vsel %vm454_vm1, %v442_v4, %v443_v11 }
  0xf3   :  { %v465_v19 = vsel %vm454_vm1, %v440_v6, %v441_v14  ;;  %v464_v20 = vsel %vm454_vm1, %v441_v14, %v442_v4 }
  0xf4   :  { %v429_v21 = vpack.c.bf16 %v415_v16, %v414_v15 }
  0xf5   :  { %v236_v22 = vpop.f32.mrb[8].mxu0  ;;  %v1064_v23 = vpop.f32.mrb[8].mxu1 }
  0xf6   :  { %v400_v24 = vadd.f32 %v1298_v38, %v236_v22  ;;  %v238_v25 = vpop.f32.mrb[9].mxu0  ;;  %646 = vmatmul.mubr.bf16.gmra.mrb[36].mxu0 %v429_v21  ;;  %v361_v26 = vpop.f32.mrb[9].mxu1  ;;  %v446_v29 = vrot.slane %v1064_v23, 1 }
  0xf7   :  { %v1336_v27 = vadd.f32 %v465_v19, %v238_v25  ;;  %v240_v28 = vpop.f32.mrb[10].mxu0  ;;  %v444_v30 = vrot.slane %v361_v26, 1  ;;  %v1065_v31 = vpop.f32.mrb[10].mxu1 }
  0xf8   :  { %v401_v32 = vadd.f32 %v1298_v38, %v240_v28  ;;  %v242_v33 = vpop.f32.mrb[11].mxu0  ;;  %v447_v34 = vrot.slane %v1065_v31, 1  ;;  %v364_v35 = vpop.f32.mrb[11].mxu1  ;;  %v416_v41 = vmax.f32 %v400_v24, 0.0 }
  0xf9   :  { %v1339_v36 = vadd.f32 %v464_v20, %v242_v33  ;;  %v462_v37 = vsel %vm454_vm1, %v443_v11, %v444_v30  ;;  %v445_v40 = vrot.slane %v364_v35, 1 }
  0xfa   :  { %v417_v42 = vmax.f32 %v401_v32, 0.0  ;;  %v459_v43 = vsel %vm454_vm1, %v446_v29, %v447_v34 }
  0xfb   :  { %v461_v45 = vsel %vm454_vm1, %v444_v30, %v445_v40  ;;  %v460_v47 = vsel %vm454_vm1, %v445_v40, %v446_v29 }
  0xfc   :  { %v430_v48 = vpack.c.bf16 %v417_v42, %v416_v41 }
  0xfd   :  { %v246_v49 = vpop.f32.mrb[12].mxu0  ;;  %v1068_v50 = vpop.f32.mrb[12].mxu1 }
  0xfe   :  { %v402_v51 = vadd.f32 %v1298_v38, %v246_v49  ;;  %v248_v52 = vpop.f32.mrb[13].mxu0  ;;  %656 = vmatmul.mubr.bf16.vlgmr.msra.gmra.mrb[16].mxu1 %v430_v48  ;;  %v377_v53 = vpop.f32.mrb[13].mxu1  ;;  %v450_v56 = vrot.slane %v1068_v50, 1 }
  0xff   :  { %v1350_v54 = vadd.f32 %v463_v18, %v248_v52  ;;  %v250_v55 = vpop.f32.mrb[14].mxu0  ;;  %665 = vmatprep.mubr.bf16.mxu1 %v1135_v1  ;;  %v448_v57 = vrot.slane %v377_v53, 1  ;;  %v1069_v58 = vpop.f32.mrb[14].mxu1 }
 0x100   :  { %v403_v59 = vadd.f32 %v1298_v38, %v250_v55  ;;  %v252_v62 = vpop.f32.mrb[15].mxu0  ;;  %v451_v63 = vrot.slane %v1069_v58, 1  ;;  %v380_v0 = vpop.f32.mrb[15].mxu1  ;;  %v418_v6 = vmax.f32 %v402_v51, 0.0 }
 0x101   :  { %v1354_v2 = vadd.f32 %v462_v37, %v252_v62  ;;  %v458_v3 = vsel %vm454_vm1, %v447_v34, %v448_v57  ;;  %v449_v4 = vrot.slane %v380_v0, 1 }
 0x102   :  { %v419_v7 = vmax.f32 %v403_v59, 0.0  ;;  %v455_v8 = vsel %vm454_vm1, %v450_v56, %v451_v63  ;;  %v470_v9 = vsel %vm454_vm1, %v451_v63, %v436_v46 }
 0x103   :  { %v457_v10 = vsel %vm454_vm1, %v448_v57, %v449_v4  ;;  %v456_v11 = vsel %vm454_vm1, %v449_v4, %v450_v56 }
 0x104   :  { %v431_v12 = vpack.c.bf16 %v419_v7, %v418_v6 }
 0x105   :  { %v256_v13 = vpop.f32.mrb[16].mxu0 }
 0x106   :  { %v404_v14 = vadd.f32 %v1298_v38, %v256_v13  ;;  %v258_v15 = vpop.f32.mrb[17].mxu0  ;;  %666 = vmatmul.mubr.bf16.gmra.mrb[20].mxu1 %v431_v12 }
 0x107   :  { %v1369_v16 = vadd.f32 %v461_v45, %v258_v15  ;;  %v260_v18 = vpop.f32.mrb[18].mxu0  ;;  %675 = vmatprep.mubr.bf16.mxu1 %v1135_v1 }
 0x108   :  { %v405_v44 = vadd.f32 %v1298_v38, %v260_v18  ;;  %v262_v46 = vpop.f32.mrb[19].mxu0  ;;  %v420_v20 = vmax.f32 %v404_v14, 0.0 }
 0x109   :  { %v1373_v19 = vadd.f32 %v460_v47, %v262_v46 }
 0x10a   :  { %v421_v21 = vmax.f32 %v405_v44, 0.0 }
 0x10c   :  { %v432_v22 = vpack.c.bf16 %v421_v21, %v420_v20 }
 0x10d   :  { %v266_v23 = vpop.f32.mrb[20].mxu0 }
 0x10e   :  { %v406_v24 = vadd.f32 %v1298_v38, %v266_v23  ;;  %v268_v25 = vpop.f32.mrb[21].mxu0  ;;  %676 = vmatmul.mubr.bf16.gmra.mrb[24].mxu1 %v432_v22 }
 0x10f   :  { %v1376_v26 = vadd.f32 %v459_v43, %v268_v25  ;;  %v270_v28 = vpop.f32.mrb[22].mxu0  ;;  %685 = vmatprep.mubr.bf16.mxu1 %v1135_v1 }
 0x110   :  { %v407_v29 = vadd.f32 %v1298_v38, %v270_v28  ;;  %v272_v30 = vpop.f32.mrb[23].mxu0  ;;  %v422_v32 = vmax.f32 %v406_v24, 0.0 }
 0x111   :  { %v1380_v31 = vadd.f32 %v458_v3, %v272_v30 }
 0x112   :  { %v423_v33 = vmax.f32 %v407_v29, 0.0 }
 0x114   :  { %v433_v34 = vpack.c.bf16 %v423_v33, %v422_v32 }
 0x115   :  { %v276_v35 = vpop.f32.mrb[24].mxu0 }
 0x116   :  { %v408_v37 = vadd.f32 %v1298_v38, %v276_v35  ;;  %v278_v40 = vpop.f32.mrb[25].mxu0  ;;  %686 = vmatmul.mubr.bf16.gmra.mrb[28].mxu1 %v433_v34 }
 0x117   :  { %v1383_v41 = vadd.f32 %v457_v10, %v278_v40  ;;  %v280_v42 = vpop.f32.mrb[26].mxu0  ;;  %695 = vmatprep.mubr.bf16.mxu1 %v1135_v1 }
 0x118   :  { %v409_v43 = vadd.f32 %v1298_v38, %v280_v42  ;;  %v282_v45 = vpop.f32.mrb[27].mxu0  ;;  %v424_v48 = vmax.f32 %v408_v37, 0.0 }
 0x119   :  { %v1387_v47 = vadd.f32 %v456_v11, %v282_v45  ;;  %v1411_v11 = vld [vmem:[%s1520_s3 + $0x2] ss:$0 sm:$0xff] }
 0x11a   :  { %v425_v49 = vmax.f32 %v409_v43, 0.0  ;;  %v491_v44 = vadd.f32 %v1411_v11, %v1316_v60  ;;  %v492_v32 = vadd.f32 %v1411_v11, %v1318_v61  ;;  %v493_v40 = vadd.f32 %v1411_v11, %v1321_v5 }
 0x11c   :  { %v434_v50 = vpack.c.bf16 %v425_v49, %v424_v48 }
 0x11d   :  { %v286_v51 = vpop.f32.mrb[28].mxu0 }
 0x11e   :  { %v410_v52 = vadd.f32 %v1298_v38, %v286_v51  ;;  %v288_v53 = vpop.f32.mrb[29].mxu0  ;;  %696 = vmatmul.mubr.bf16.gmra.mrb[32].mxu1 %v434_v50 }
 0x11f   :  { %v1390_v55 = vadd.f32 %v455_v8, %v288_v53  ;;  %v290_v56 = vpop.f32.mrb[30].mxu0  ;;  %705 = vmatprep.mubr.bf16.mxu1 %v1135_v1  ;;  %v1402_v1 = vld [vmem:[%s1520_s3 + $0x1] ss:$0 sm:$0xff] }
 0x120   :  { %v411_v57 = vadd.f32 %v1298_v38, %v290_v56  ;;  %v292_v58 = vpop.f32.mrb[31].mxu0  ;;  %v426_v62 = vmax.f32 %v410_v52, 0.0 }
 0x121   :  { %v1394_v59 = vadd.f32 %v470_v9, %v292_v58  ;;  %v505_v39 = vadd.f32 %v1411_v11, %v1390_v55 }
 0x122   :  { %v427_v63 = vmax.f32 %v411_v57, 0.0  ;;  %v494_v57 = vadd.f32 %v1411_v11, %v1327_v17 }
 0x124   :  { %v435_v0 = vpack.c.bf16 %v427_v63, %v426_v62 }
 0x126   :  { %706 = vmatmul.mubr.bf16.gmra.mrb[36].mxu1 %v435_v0 }
 0x1c1   :  { %v637_v3 = vpop.f32.mrb[32].mxu0 }
 0x1c2   :  { %v1396_v4 = vpop.f32.mrb[33].mxu0 }
 0x1c3   :  { %v641_v6 = vpop.f32.mrb[34].mxu0  ;;  %v716_v8 = vrot.slane %v1396_v4, 1  ;;  %v506_v4 = vadd.f32 %v1411_v11, %v1394_v59 }
 0x1c4   :  { %v643_v7 = vpop.f32.mrb[35].mxu0 }
 0x1c5   :  { %v717_v10 = vrot.slane %v643_v7, 1 }
 0x1c7   :  { %v746_v38 = vsel %vm454_vm1, %v716_v8, %v717_v10 }
 0x1c8   :  { %v748_v9 = vadd.f32 %v746_v38, %v637_v3 }
 0x1c9   :  { %v647_v12 = vpop.f32.mrb[36].mxu0 }
 0x1ca   :  { %v768_v13 = vadd.f32 %v1402_v1, %v748_v9  ;;  %v649_v14 = vpop.f32.mrb[37].mxu0 }
 0x1cb   :  { %v718_v15 = vrot.slane %v649_v14, 1  ;;  %v651_v18 = vpop.f32.mrb[38].mxu0 }
 0x1cc   :  { %v784_v46 = vmax.f32 %v768_v13, 0.0  ;;  %v653_v20 = vpop.f32.mrb[39].mxu0 }
 0x1cd   :  { %v745_v21 = vsel %vm454_vm1, %v717_v10, %v718_v15  ;;  %v719_v22 = vrot.slane %v653_v20, 1 }
 0x1ce   :  { %v800_v23 = vadd.f32 %v784_v46, %v491_v44  ;;  %v749_v24 = vadd.f32 %v745_v21, %v641_v6  ;;  %v495_v6 = vadd.f32 %v1411_v11, %v1336_v27  ;;  %v496_v46 = vadd.f32 %v1411_v11, %v1339_v36 }
 0x1cf   :  { %v744_v25 = vsel %vm454_vm1, %v718_v15, %v719_v22 }
 0x1d0   :  { %v769_v28 = vadd.f32 %v1402_v1, %v749_v24  ;;  %v750_v29 = vadd.f32 %v744_v25, %v647_v12  ;;  %v497_v25 = vadd.f32 %v1411_v11, %v1350_v54 }
 0x1d1   :  { %v657_v30 = vpop.f32.mrb[16].mxu1 }
 0x1d2   :  { %v785_v33 = vmax.f32 %v769_v28, 0.0  ;;  %v770_v60 = vadd.f32 %v1402_v1, %v750_v29  ;;  %v659_v34 = vpop.f32.mrb[17].mxu1 }
 0x1d3   :  { %v720_v35 = vrot.slane %v659_v34, 1  ;;  %v661_v37 = vpop.f32.mrb[18].mxu1 }
 0x1d4   :  { %v801_v42 = vadd.f32 %v785_v33, %v492_v32  ;;  %v786_v43 = vmax.f32 %v770_v60, 0.0  ;;  %v663_v45 = vpop.f32.mrb[19].mxu1 }
 0x1d5   :  { %v743_v48 = vsel %vm454_vm1, %v719_v22, %v720_v35  ;;  %v721_v49 = vrot.slane %v663_v45, 1 }
 0x1d6   :  { %v990_v50 = vpack.c.bf16 %v801_v42, %v800_v23  ;;  %v802_v51 = vadd.f32 %v786_v43, %v493_v40  ;;  %v751_v52 = vadd.f32 %v743_v48, %v651_v18  ;;  %v498_v42 = vadd.f32 %v1411_v11, %v1354_v2 }
 0x1d7   :  { %v742_v61 = vsel %vm454_vm1, %v720_v35, %v721_v49 }
 0x1d8   :  { %991 = vst [vmem:[%s1521_s4] sm:$0xff] %v990_v50   ;;  %v771_v53 = vadd.f32 %v1402_v1, %v751_v52  ;;  %v752_v5 = vadd.f32 %v742_v61, %v657_v30 }
 0x1d9   :  { %v667_v56 = vpop.f32.mrb[20].mxu1 }
 0x1da   :  { %v787_v58 = vmax.f32 %v771_v53, 0.0  ;;  %v772_v62 = vadd.f32 %v1402_v1, %v752_v5  ;;  %v669_v63 = vpop.f32.mrb[21].mxu1 }
 0x1db   :  { %v722_v0 = vrot.slane %v669_v63, 1  ;;  %v671_v3 = vpop.f32.mrb[22].mxu1 }
 0x1dc   :  { %v803_v7 = vadd.f32 %v787_v58, %v494_v57  ;;  %v788_v10 = vmax.f32 %v772_v62, 0.0  ;;  %v673_v38 = vpop.f32.mrb[23].mxu1 }
 0x1dd   :  { %v741_v9 = vsel %vm454_vm1, %v721_v49, %v722_v0  ;;  %v723_v12 = vrot.slane %v673_v38, 1 }
 0x1de   :  { %v995_v13 = vpack.c.bf16 %v803_v7, %v802_v51  ;;  %v804_v14 = vadd.f32 %v788_v10, %v495_v6  ;;  %v753_v15 = vadd.f32 %v741_v9, %v661_v37  ;;  %v499_v51 = vadd.f32 %v1411_v11, %v1369_v16 }
 0x1df   :  { %v740_v17 = vsel %vm454_vm1, %v722_v0, %v723_v12 }
 0x1e0   :  { %1027 = vst [vmem:[%s1521_s4 + $0x8] sm:$0xff] %v995_v13   ;;  %v773_v18 = vadd.f32 %v1402_v1, %v753_v15  ;;  %v754_v27 = vadd.f32 %v740_v17, %v667_v56 }
 0x1e1   :  { %v677_v44 = vpop.f32.mrb[24].mxu1 }
 0x1e2   :  { %v789_v20 = vmax.f32 %v773_v18, 0.0  ;;  %v774_v21 = vadd.f32 %v1402_v1, %v754_v27  ;;  %v679_v22 = vpop.f32.mrb[25].mxu1 }
 0x1e3   :  { %v724_v23 = vrot.slane %v679_v22, 1  ;;  %v681_v24 = vpop.f32.mrb[26].mxu1  ;;  %v502_v22 = vadd.f32 %v1411_v11, %v1380_v31 }
 0x1e4   :  { %v805_v28 = vadd.f32 %v789_v20, %v496_v46  ;;  %v790_v29 = vmax.f32 %v774_v21, 0.0  ;;  %v683_v30 = vpop.f32.mrb[27].mxu1 }
 0x1e5   :  { %v739_v32 = vsel %vm454_vm1, %v723_v12, %v724_v23  ;;  %v725_v33 = vrot.slane %v683_v30, 1  ;;  %v501_v12 = vadd.f32 %v1411_v11, %v1376_v26  ;;  %v503_v30 = vadd.f32 %v1411_v11, %v1383_v41 }
 0x1e6   :  { %v1000_v60 = vpack.c.bf16 %v805_v28, %v804_v14  ;;  %v806_v34 = vadd.f32 %v790_v29, %v497_v25  ;;  %v755_v35 = vadd.f32 %v739_v32, %v671_v3  ;;  %v500_v3 = vadd.f32 %v1411_v11, %v1373_v19 }
 0x1e7   :  { %v738_v36 = vsel %vm454_vm1, %v724_v23, %v725_v33 }
 0x1e8   :  { %1028 = vst [vmem:[%s1521_s4 + $0x10] sm:$0xff] %v1000_v60   ;;  %v775_v37 = vadd.f32 %v1402_v1, %v755_v35  ;;  %v756_v54 = vadd.f32 %v738_v36, %v677_v44 }
 0x1e9   :  { %v687_v40 = vpop.f32.mrb[28].mxu1 }
 0x1ea   :  { %v791_v43 = vmax.f32 %v775_v37, 0.0  ;;  %v776_v45 = vadd.f32 %v1402_v1, %v756_v54  ;;  %v689_v48 = vpop.f32.mrb[29].mxu1 }
 0x1eb   :  { %v726_v49 = vrot.slane %v689_v48, 1  ;;  %v691_v50 = vpop.f32.mrb[30].mxu1 }
 0x1ec   :  { %v807_v52 = vadd.f32 %v791_v43, %v498_v42  ;;  %v792_v61 = vmax.f32 %v776_v45, 0.0  ;;  %v693_v53 = vpop.f32.mrb[31].mxu1  ;;  %v504_v45 = vadd.f32 %v1411_v11, %v1387_v47 }
 0x1ed   :  { %v737_v5 = vsel %vm454_vm1, %v725_v33, %v726_v49  ;;  %v727_v56 = vrot.slane %v693_v53, 1 }
 0x1ee   :  { %v1005_v57 = vpack.c.bf16 %v807_v52, %v806_v34  ;;  %v808_v58 = vadd.f32 %v792_v61, %v499_v51  ;;  %v757_v62 = vadd.f32 %v737_v5, %v681_v24 }
 0x1ef   :  { %v736_v2 = vsel %vm454_vm1, %v726_v49, %v727_v56 }
 0x1f0   :  { %1029 = vst [vmem:[%s1521_s4 + $0x18] sm:$0xff] %v1005_v57   ;;  %v777_v63 = vadd.f32 %v1402_v1, %v757_v62  ;;  %v758_v16 = vadd.f32 %v736_v2, %v687_v40 }
 0x1f1   :  { %v697_v0 = vpop.f32.mrb[32].mxu1 }
 0x1f2   :  { %v793_v6 = vmax.f32 %v777_v63, 0.0  ;;  %v778_v7 = vadd.f32 %v1402_v1, %v758_v16  ;;  %v699_v10 = vpop.f32.mrb[33].mxu1 }
 0x1f3   :  { %v728_v38 = vrot.slane %v699_v10, 1  ;;  %v701_v9 = vpop.f32.mrb[34].mxu1 }
 0x1f4   :  { %v809_v13 = vadd.f32 %v793_v6, %v500_v3  ;;  %v794_v14 = vmax.f32 %v778_v7, 0.0  ;;  %v703_v15 = vpop.f32.mrb[35].mxu1 }
 0x1f5   :  { %v735_v17 = vsel %vm454_vm1, %v727_v56, %v728_v38  ;;  %v729_v18 = vrot.slane %v703_v15, 1 }
 0x1f6   :  { %v1010_v27 = vpack.c.bf16 %v809_v13, %v808_v58  ;;  %v810_v44 = vadd.f32 %v794_v14, %v501_v12  ;;  %v759_v46 = vadd.f32 %v735_v17, %v691_v50 }
 0x1f7   :  { %v734_v19 = vsel %vm454_vm1, %v728_v38, %v729_v18 }
 0x1f8   :  { %1030 = vst [vmem:[%s1521_s4 + $0x20] sm:$0xff] %v1010_v27   ;;  %v779_v20 = vadd.f32 %v1402_v1, %v759_v46  ;;  %v760_v26 = vadd.f32 %v734_v19, %v697_v0 }
 0x1f9   :  { %v707_v21 = vpop.f32.mrb[36].mxu1 }
 0x1fa   :  { %v795_v23 = vmax.f32 %v779_v20, 0.0  ;;  %v780_v24 = vadd.f32 %v1402_v1, %v760_v26  ;;  %v709_v25 = vpop.f32.mrb[37].mxu1 }
 0x1fb   :  { %v730_v28 = vrot.slane %v709_v25, 1  ;;  %v711_v29 = vpop.f32.mrb[38].mxu1 }
 0x1fc   :  { %v811_v32 = vadd.f32 %v795_v23, %v502_v22  ;;  %v796_v33 = vmax.f32 %v780_v24, 0.0  ;;  %v713_v60 = vpop.f32.mrb[39].mxu1 }
 0x1fd   :  { %v733_v34 = vsel %vm454_vm1, %v729_v18, %v730_v28  ;;  %v731_v35 = vrot.slane %v713_v60, 1 }
 0x1fe   :  { %v1015_v36 = vpack.c.bf16 %v811_v32, %v810_v44  ;;  %v812_v37 = vadd.f32 %v796_v33, %v503_v30  ;;  %v761_v54 = vadd.f32 %v733_v34, %v701_v9 }
 0x1ff   :  { %v732_v31 = vsel %vm454_vm1, %v730_v28, %v731_v35  ;;  %v747_v40 = vsel %vm454_vm1, %v731_v35, %v716_v8 }
 0x200   :  { %1031 = vst [vmem:[%s1521_s4 + $0x28] sm:$0xff] %v1015_v36   ;;  %v781_v41 = vadd.f32 %v1402_v1, %v761_v54  ;;  %v762_v42 = vadd.f32 %v732_v31, %v707_v21  ;;  %v763_v43 = vadd.f32 %v747_v40, %v711_v29 }
 0x202   :  { %v797_v48 = vmax.f32 %v781_v41, 0.0  ;;  %v782_v49 = vadd.f32 %v1402_v1, %v762_v42  ;;  %v783_v50 = vadd.f32 %v1402_v1, %v763_v43 }
 0x204   :  { %v813_v8 = vadd.f32 %v797_v48, %v504_v45  ;;  %v798_v51 = vmax.f32 %v782_v49, 0.0  ;;  %v799_v52 = vmax.f32 %v783_v50, 0.0 }
 0x206   :  { %v1020_v61 = vpack.c.bf16 %v813_v8, %v812_v37  ;;  %v814_v53 = vadd.f32 %v798_v51, %v505_v39  ;;  %v815_v5 = vadd.f32 %v799_v52, %v506_v4 }
 0x208   :  { %1032 = vst [vmem:[%s1521_s4 + $0x30] sm:$0xff] %v1020_v61   ;;  %v1025_v47 = vpack.c.bf16 %v815_v5, %v814_v53 }
 0x20a   :  { %1033 = vst [vmem:[%s1521_s4 + $0x38] sm:$0xff] %v1025_v47  }

</bundles_post_ra>
